<compile_context>
chip_gen: v6e
topology: v6e:2x2x1
jax: 0.10.0
libtpu: 0.0.40
codegen_flags: <defaults>
</compile_context>

<pallas_src>
import functools
import math

import jax
import jax.numpy as jnp
from jax.experimental import pallas as pl
from jax.experimental.pallas import tpu as pltpu


# ----------------------------------------------------------------------------
# helpers
# ----------------------------------------------------------------------------
def _pick_tile_m(m):
    for t in (512, 256, 128, 64, 32, 16, 8):
        if m % t == 0:
            return t
    return m


def _pick_row_block(s):
    for t in (8, 4, 2, 1):
        if s % t == 0:
            return t
    return 1


def _vmem_limit_bytes(elem_count, itemsize=4):
    # double-buffered blocks + slack, clamped so it is safe on every generation
    need = 4 * int(elem_count) * itemsize + (8 << 20)
    return int(min(100 * 2**20, max(32 * 2**20, need)))


def _diag_gather(x, out_w, *, ascending, block_rows):
    """y[i, :] = x[i, start_i : start_i + out_w] with
       start_i = i            if ascending
       start_i = S - 1 - i    otherwise.
    Built only from static slices + iota-masked selects (Mosaic-safe).
    Requires x.shape[1] >= S - 1 + out_w."""
    s = x.shape[0]
    t = block_rows
    sub = jax.lax.broadcasted_iota(jnp.int32, (t, out_w), 0)
    blocks = []
    for r in range(s // t):
        row0 = r * t
        base = row0 if ascending else (s - t - row0)
        sup = x[row0:row0 + t, base:base + out_w + t - 1]      # (t, out_w+t-1)
        acc = jnp.zeros((t, out_w), x.dtype)
        for d in range(t):
            delta = d if ascending else (t - 1 - d)
            acc = jnp.where(sub == delta, sup[:, d:d + out_w], acc)
        blocks.append(acc)
    return blocks[0] if len(blocks) == 1 else jnp.concatenate(blocks, axis=0)


# ----------------------------------------------------------------------------
# Linear (nn.Linear) kernel:  y = x @ W_t + b   (W_t pre-transposed outside)
# ----------------------------------------------------------------------------
def _linear_kernel(x_ref, w_ref, b_ref, o_ref):
    acc = jnp.dot(x_ref[...], w_ref[...], preferred_element_type=jnp.float32)
    o_ref[...] = (acc + b_ref[...].astype(jnp.float32)).astype(o_ref.dtype)


def linear_pallas(x2d, w_t, b):
    m, din = x2d.shape
    dout = w_t.shape[1]
    tm = _pick_tile_m(m)
    limit = _vmem_limit_bytes(tm * din + din * dout + dout + tm * dout,
                              x2d.dtype.itemsize)
    return pl.pallas_call(
        _linear_kernel,
        out_shape=jax.ShapeDtypeStruct((m, dout), x2d.dtype),
        grid=(m // tm,),
        in_specs=[
            pl.BlockSpec((tm, din), lambda i: (i, 0)),
            pl.BlockSpec((din, dout), lambda i: (0, 0)),   # fetched once
            pl.BlockSpec((1, dout), lambda i: (0, 0)),
        ],
        out_specs=pl.BlockSpec((tm, dout), lambda i: (i, 0)),
        compiler_params=pltpu.CompilerParams(
            dimension_semantics=("parallel",),
            vmem_limit_bytes=limit),
    )(x2d, w_t, b.reshape(1, dout))


# ----------------------------------------------------------------------------
# Relative attention core kernel.  One grid cell per batch (all heads inside).
#   qkv_ref : (1, S, 3*D)       lane-dense fused q|k|v
#   ek_ref  : (2S-1, head_dim)  compact rel-key table, bucket order reversed
#   ev_ref  : (2S-1, head_dim)  compact rel-value table, bucket order reversed
#   o_ref   : (1, S, D)
# ----------------------------------------------------------------------------
def _rel_attn_kernel(qkv_ref, ek_ref, ev_ref, o_ref, *,
                     num_heads, head_dim, scale, block_rows):
    s = o_ref.shape[1]
    d = num_heads * head_dim
    qkv = qkv_ref[0]                       # (S, 3D), native dtype
    ek = ek_ref[...]                       # (2S-1, hd)
    ev = ev_ref[...]                       # (2S-1, hd)

    outs = []
    for h in range(num_heads):             # static unrolled loop over heads
        lo = h * head_dim
        hi = lo + head_dim
        qh = qkv[:, lo:hi]                 # (S, hd)
        kh = qkv[:, d + lo:d + hi]
        vh = qkv[:, 2 * d + lo:2 * d + hi]

        # content term (MXU)
        qk = jax.lax.dot_general(qh, kh, (((1,), (1,)), ((), ())),
                                 preferred_element_type=jnp.float32)   # (S,S)
        # relative-key term: MXU matmul against the compact table + skew
        rlog = jax.lax.dot_general(qh, ek, (((1,), (1,)), ((), ())),
                                   preferred_element_type=jnp.float32)  # (S,2S-1)
        qk_r = _diag_gather(rlog, s, ascending=False, block_rows=block_rows)

        logits = (qk + qk_r) * scale

        # numerically stable softmax; divide via EUP reciprocal + 1 Newton step
        mx = jnp.max(logits, axis=-1, keepdims=True)
        e = jnp.exp(logits - mx)
        l = jnp.sum(e, axis=-1, keepdims=True)
        inv = pl.reciprocal(l, approx=True)
        inv = inv * (2.0 - l * inv)
        probs = e * inv                                                # (S,S) f32

        # content value term (MXU)
        attn = jnp.dot(probs.astype(vh.dtype), vh,
                       preferred_element_type=jnp.float32)             # (S,hd)

        # relative-value term: inverse skew of probs + one MXU matmul
        if s > 1:
            zpad = jnp.zeros((s, s - 1), probs.dtype)
            probs_pad = jnp.concatenate([zpad, probs, zpad], axis=1)   # (S,3S-2)
        else:
            probs_pad = probs
        p_rel = _diag_gather(probs_pad, 2 * s - 1, ascending=True,
                             block_rows=block_rows)                    # (S,2S-1)
        attn_r = jnp.dot(p_rel.astype(ev.dtype), ev,
                         preferred_element_type=jnp.float32)           # (S,hd)

        outs.append(attn + attn_r)

    o_ref[0] = jnp.concatenate(outs, axis=1).astype(o_ref.dtype)       # (S,D)


def attention_pallas(qkv, ek_rev, ev_rev, num_heads):
    b, s, three_d = qkv.shape
    d = three_d // 3
    hd = d // num_heads
    kern = functools.partial(
        _rel_attn_kernel, num_heads=num_heads, head_dim=hd,
        scale=1.0 / math.sqrt(hd), block_rows=_pick_row_block(s))
    limit = _vmem_limit_bytes(s * three_d + s * d + 2 * (2 * s - 1) * hd,
                              qkv.dtype.itemsize)
    return pl.pallas_call(
        kern,
        out_shape=jax.ShapeDtypeStruct((b, s, d), qkv.dtype),
        grid=(b,),
        in_specs=[
            pl.BlockSpec((1, s, three_d), lambda i: (i, 0, 0)),
            pl.BlockSpec((2 * s - 1, hd), lambda i: (0, 0)),   # resident
            pl.BlockSpec((2 * s - 1, hd), lambda i: (0, 0)),   # resident
        ],
        out_specs=pl.BlockSpec((1, s, d), lambda i: (i, 0, 0)),
        compiler_params=pltpu.CompilerParams(
            dimension_semantics=("parallel",),
            vmem_limit_bytes=limit),
    )(qkv, ek_rev, ev_rev)


# ----------------------------------------------------------------------------
# Full module forward (Pallas kernels + small plain-JAX parameter prep)
# ----------------------------------------------------------------------------
def relative_mhsa(x, params, num_heads, max_seq_len):
    b, s, d = x.shape

    # parameter prep (plain JAX, O(params), done once per call)
    w_qkv = jnp.concatenate([params["wq"], params["wk"], params["wv"]], axis=0).T  # (D,3D)
    b_qkv = jnp.concatenate([params["bq"], params["bk"], params["bv"]], axis=0)    # (3D,)
    w_o = params["wo"].T                                                           # (D,D)

    # Compact relative tables indexed by relative distance, bucket order
    # reversed so the in-kernel skew uses ascending windows.
    # NOTE: PyTorch's clamp(0, 2L+1) is a latent off-by-one (row 2L+1 does not
    # exist); clamping to the last valid row 2L is identical in every regime
    # where the module is usable (S <= max_seq_len + 1).
    rel_ids = jnp.clip(jnp.arange(2 * s - 1) - (s - 1) + max_seq_len,
                       0, 2 * max_seq_len)
    ek_rev = params["rel_k_emb"][rel_ids][::-1]   # (2S-1, head_dim)
    ev_rev = params["rel_v_emb"][rel_ids][::-1]   # (2S-1, head_dim)

    # fused Q/K/V projection (one tiled MXU matmul)
    qkv = linear_pallas(x.reshape(b * s, d), w_qkv, b_qkv).reshape(b, s, 3 * d)

    # relative attention, all heads per grid step, lane-dense (B,S,D) layout
    attn = attention_pallas(qkv, ek_rev, ev_rev, num_heads)          # (B,S,D)

    # output projection
    out = linear_pallas(attn.reshape(b * s, d), w_o, params["bo"])
    return out.reshape(b, s, d)


# ----------------------------------------------------------------------------
# Pure-JAX reference (mirrors the PyTorch forward)
# ----------------------------------------------------------------------------
def relative_mhsa_reference(x, params, num_heads, max_seq_len):
    b, s, d = x.shape
    hd = d // num_heads
    lin = lambda t, w, bb: t @ w.T + bb

    q = lin(x, params["wq"], params["bq"]).reshape(b, s, num_heads, hd).transpose(0, 2, 1, 3)
    k = lin(x, params["wk"], params["bk"]).reshape(b, s, num_heads, hd).transpose(0, 2, 1, 3)
    v = lin(x, params["wv"], params["bv"]).reshape(b, s, num_heads, hd).transpose(0, 2, 1, 3)

    qk = jnp.einsum("bhid,bhjd->bhij", q, k)
    pos = jnp.arange(s)[:, None] - jnp.arange(s)[None, :] + max_seq_len
    pos = jnp.clip(pos, 0, 2 * max_seq_len)   # last valid embedding row
    rel_k = params["rel_k_emb"][pos]
    qk_r = jnp.einsum("bhid,ijd->bhij", q, rel_k)
    logits = (qk + qk_r) / math.sqrt(hd)
    probs = jax.nn.softmax(logits, axis=-1)
    attn = jnp.einsum("bhij,bhjd->bhid", probs, v)
    rel_v = params["rel_v_emb"][pos]
    attn_r = jnp.einsum("bhij,ijd->bhid", probs, rel_v)
    attn = attn + attn_r
    out = attn.transpose(0, 2, 1, 3).reshape(b, s, d)
    return lin(out, params["wo"], params["bo"])


# ----------------------------------------------------------------------------
# Deterministic parameter init + test
# ----------------------------------------------------------------------------
def init_params(key, d_model, head_dim, max_seq_len):
    ks = jax.random.split(key, 10)

    def lin_init(kw, kb, din, dout):
        w = jax.random.normal(kw, (dout, din), jnp.float32) * 0.05
        bb = jax.random.normal(kb, (dout,), jnp.float32) * 0.05
        return w, bb

    wq, bq = lin_init(ks[0], ks[1], d_model, d_model)
    wk, bk = lin_init(ks[2], ks[3], d_model, d_model)
    wv, bv = lin_init(ks[4], ks[5], d_model, d_model)
    wo, bo = lin_init(ks[6], ks[7], d_model, d_model)
    rel_k_emb = jax.random.normal(ks[8], (2 * max_seq_len + 1, head_dim), jnp.float32) * 0.05
    rel_v_emb = jax.random.normal(ks[9], (2 * max_seq_len + 1, head_dim), jnp.float32) * 0.05
    return dict(wq=wq, bq=bq, wk=wk, bk=bk, wv=wv, bv=bv, wo=wo, bo=bo,
                rel_k_emb=rel_k_emb, rel_v_emb=rel_v_emb)


if __name__ == "__main__":
    # Config: d_model=32, num_heads=4 (head_dim=8), max_seq_len=16
    B, S, d_model, num_heads, max_seq_len = 2, 8, 32, 4, 16
    head_dim = d_model // num_heads

    key = jax.random.PRNGKey(0)
    k_param, k_x = jax.random.split(key)
    params = init_params(k_param, d_model, head_dim, max_seq_len)
    x = jax.random.normal(k_x, (B, S, d_model), jnp.float32)

    out = relative_mhsa(x, params, num_heads, max_seq_len)
    out = jax.block_until_ready(out)

    ref = relative_mhsa_reference(x, params, num_heads, max_seq_len)
    assert out.shape == (B, S, d_model)
    assert jnp.allclose(out, ref, atol=2e-4, rtol=2e-4), (
        f"max abs err = {jnp.max(jnp.abs(out - ref))}")

    print("KERNEL_OK")
</pallas_src>

<mosaic_0001>
module attributes {stable_mosaic.version = 11 : i64} {
  func.func @_linear_kernel(%arg0: i32, %arg1: memref<16x32xf32, #tpu.memory_space<vmem>>, %arg2: memref<32x96xf32, #tpu.memory_space<vmem>>, %arg3: memref<1x96xf32, #tpu.memory_space<vmem>>, %arg4: memref<16x96xf32, #tpu.memory_space<vmem>>) attributes {dimension_semantics = [#tpu.dimension_semantics<parallel>], iteration_bounds = array<i64: 1>, scalar_prefetch = 0 : i64, scratch_operands = 0 : i64, tpu.core_type = #tpu.core_type<tc>, window_params = [{transform_indices = @transform_0, window_bounds = array<i64: 16, 32>}, {pipeline_mode = #tpu.pipeline_mode<synchronous>, transform_indices = @transform_1, window_bounds = array<i64: 32, 96>}, {pipeline_mode = #tpu.pipeline_mode<synchronous>, transform_indices = @transform_2, window_bounds = array<i64: 1, 96>}, {transform_indices = @transform_3, window_bounds = array<i64: 16, 96>}]} {
    %c0 = arith.constant 0 : index
    %c0_0 = arith.constant 0 : index
    %0 = vector.load %arg1[%c0, %c0_0] : memref<16x32xf32, #tpu.memory_space<vmem>>, vector<16x32xf32>
    %c0_1 = arith.constant 0 : index
    %c0_2 = arith.constant 0 : index
    %1 = vector.load %arg2[%c0_1, %c0_2] : memref<32x96xf32, #tpu.memory_space<vmem>>, vector<32x96xf32>
    %cst = arith.constant dense<0.000000e+00> : vector<16x96xf32>
    %2 = tpu.matmul %0, %1, %cst {dimension_numbers = #tpu.dot_dimension_numbers<[1], [0], [0], [1], [0, 0, 1, 1], [], []>} : vector<16x32xf32>, vector<32x96xf32>, vector<16x96xf32> -> vector<16x96xf32>
    %c0_3 = arith.constant 0 : index
    %c0_4 = arith.constant 0 : index
    %3 = vector.load %arg3[%c0_3, %c0_4] : memref<1x96xf32, #tpu.memory_space<vmem>>, vector<1x96xf32>
    %4 = vector.broadcast %3 : vector<1x96xf32> to vector<16x96xf32>
    %5 = arith.addf %2, %4 : vector<16x96xf32>
    %c0_5 = arith.constant 0 : index
    %c0_6 = arith.constant 0 : index
    %6 = vector.load %arg4[%c0_5, %c0_6] : memref<16x96xf32, #tpu.memory_space<vmem>>, vector<16x96xf32>
    tpu.vector_store %arg4[%c0_5, %c0_6], %5 {strides = array<i32>} : memref<16x96xf32, #tpu.memory_space<vmem>>, vector<16x96xf32>,
    return
  }
  func.func @transform_0(%arg0: i32) -> (i32, i32) {
    %c0_i32 = arith.constant 0 : i32
    %c0_i32_0 = arith.constant 0 : i32
    return %arg0, %c0_i32 : i32, i32
  }
  func.func @transform_1(%arg0: i32) -> (i32, i32) {
    %c0_i32 = arith.constant 0 : i32
    %c0_i32_0 = arith.constant 0 : i32
    %c0_i32_1 = arith.constant 0 : i32
    return %c0_i32, %c0_i32_0 : i32, i32
  }
  func.func @transform_2(%arg0: i32) -> (i32, i32) {
    %c0_i32 = arith.constant 0 : i32
    %c0_i32_0 = arith.constant 0 : i32
    %c0_i32_1 = arith.constant 0 : i32
    return %c0_i32, %c0_i32_0 : i32, i32
  }
  func.func @transform_3(%arg0: i32) -> (i32, i32) {
    %c0_i32 = arith.constant 0 : i32
    %c0_i32_0 = arith.constant 0 : i32
    return %arg0, %c0_i32 : i32, i32
  }
}

</mosaic_0001>

<bundles_post_ra>
// kernel: tpu_custom_call.1
= control target key start
LH: loop header
LB: loop body
LE: loop exit
PB: predicated region body
PF: predicated region fallthrough
CT: control target
= control target key end

     0   :  { %8 = vsyncpa [#allocation3], 0  ;;  %s298_s0 = inlined_call_operand.hbm [shape: f32[16,32], index: 0, kind: input, shape index: {}]   ;;  %s299_s1 = inlined_call_operand.hbm [shape: f32[32,96], index: 1, kind: input, shape index: {}]   ;;  %s300_s2 = inlined_call_operand.vmem [shape: f32[1,96], index: 2, kind: input, shape index: {}]   ;;  %s301_s3 = inlined_call_operand.hbm [shape: f32[16,96], index: 3, kind: output, shape index: {}]  }
   0x1   :  { %9 = vsyncpa [#allocation6], 0 }
   0x2   :  { %10 = vsyncpa [#allocation4], 0  ;;  %s250_s12 = smov [#allocation2]  }
   0x3   :  { %s16_s13 = sshll.u32 %s250_s12, 4  ;;  %s17_s13 = int_to_ptr.vmem [resolvable:$true] %s16_s13 }
   0x4   :  { %s192_s14 = scalar_lea.vmem %s17_s13, 256  ;;  %p197_p1 = scmp.lt.s32.totalorder %s17_s13, %s17_s13 }
   0x5   :  { %p193_p0 = scmp.ne.s32.totalorder %s17_s13, %s192_s14  ;;  %p198_p2 = scmp.lt.s32.totalorder %s192_s14, %s192_s14 }
   0x7   :  { %p199_p3 = por %p198_p2, %p197_p1 }
   0x9   :  { %p200_p4 = pnand %p199_p3, %p193_p0 }
   0xb   :  { %203 = shalt.err (!%p200_p4)
}
   0xc   :  { %s251_s15 = smov 128   ;;  %s252_s16 = smov 8  }
   0xd   :  { %22 = dma.hbm_to_vmem [thread:$0]  %s298_s0, 256, %s17_s13, [#allocation3], %s251_s15, %s251_s15, %s252_s16  }
   0xe   :  { %s253_s19 = smov [#allocation5]  }
   0xf   :  { %s28_s20 = sshll.u32 %s253_s19, 4  ;;  %s29_s20 = int_to_ptr.vmem [resolvable:$true] %s28_s20 }
  0x10   :  { %s212_s21 = scalar_lea.vmem %s29_s20, 512  ;;  %p217_p6 = scmp.lt.s32.totalorder %s29_s20, %s29_s20 }
  0x11   :  { %p213_p5 = scmp.ne.s32.totalorder %s29_s20, %s212_s21  ;;  %p218_p7 = scmp.lt.s32.totalorder %s212_s21, %s212_s21 }
  0x13   :  { %p219_p8 = por %p218_p7, %p217_p6 }
  0x15   :  { %p220_p9 = pnand %p219_p8, %p213_p5 }
  0x17   :  { %223 = shalt.err (!%p220_p9)
}
  0x18   :  { %34 = dma.hbm_to_vmem [thread:$0]  %s299_s1, 512, %s29_s20, [#allocation6], %s251_s15, %s251_s15, %s252_s16  }
  0x19   :  { %244 = dma.done.wait [#allocation3], 256  }
  0x1a   :  { %245 = vsyncadd [#allocation3], 4294967040 }
  0x1b   :  { %246 = dma.done.wait [#allocation6], 512  }
  0x1c   :  { %247 = vsyncadd [#allocation6], 4294966784  ;;  %vm56_vm0 = vcmask 261120   ;;  %v48_v0 = vld [vmem:[#allocation5 + $0x18] sm:$0xff]  ;;  %v47_v1 = vld [vmem:[#allocation5 + $0x10] sm:$0xff]  ;;  %vm138_vm1 = vcmask 785408  }
  0x1d   :  { %168 = vmatprep.subr.mxu0 %v48_v0  ;;  %v43_v2 = vld [vmem:[#allocation2] sm:$0xff]  ;;  %v46_v3 = vld [vmem:[#allocation5 + $0x8] sm:$0xff]  ;;  %v45_v4 = vld [vmem:[#allocation5] sm:$0xff]  ;;  %s254_s24 = smov [#allocation7]  }
  0x1e   :  { %169 = vmatpush3.msra.mxu0 %v48_v0  ;;  %176 = vmatprep.mubr.msk.f32.mxu0 %vm56_vm0, %v43_v2  ;;  %v44_v5 = vld [vmem:[#allocation2 + $0x8] sm:$0xff]  ;;  %v159_v6 = vld [vmem:[%s300_s2] ss:$0 sm:$0xff]  ;;  %s146_s25 = sshll.u32 %s254_s24, 4  ;;  %s147_s25 = int_to_ptr.vmem [resolvable:$true] %s146_s25 }
  0x1f   :  { %170 = vmatprep.subr.mxu0 %v47_v1  ;;  %s224_s26 = scalar_lea.vmem %s147_s25, 256  ;;  %p229_p11 = scmp.lt.s32.totalorder %s147_s25, %s147_s25 }
  0x20   :  { %171 = vmatpush3.msra.mxu0 %v47_v1  ;;  %p225_p10 = scmp.ne.s32.totalorder %s147_s25, %s224_s26  ;;  %p230_p12 = scmp.lt.s32.totalorder %s224_s26, %s224_s26 }
  0x21   :  { %172 = vmatprep.subr.mxu0 %v46_v3 }
  0x22   :  { %173 = vmatpush3.msra.mxu0 %v46_v3  ;;  %p231_p13 = por %p230_p12, %p229_p11 }
  0x23   :  { %174 = vmatprep.subr.mxu0 %v45_v4 }
  0x24   :  { %175 = vmatpush3.msra.mxu0 %v45_v4  ;;  %p232_p0 = pnand %p231_p13, %p225_p10 }
  0x25   :  { %177 = vmatmul.mubr.msk.f32.vlgmr.msra.gmra.mxu0 %vm56_vm0, %v44_v5 }
  0xe5   :  { %v178_v7 = vpop.f32.mrf.mxu0 }
  0xe6   :  { %v135_v8 = vadd.f32 %v178_v7, %v159_v6 }
  0xe7   :  { %v129_v9 = vpop.f32.mrf.mxu0 }
  0xe8   :  { %v130_v10 = vadd.f32 %v159_v6, %v129_v9  ;;  %140 = vst.msk [vmem:[#allocation7 + $0x8] sm:$0xff] %vm138_vm1, %v135_v8 }
  0xea   :  { %139 = vst.msk [vmem:[#allocation7] sm:$0xff] %vm138_vm1, %v130_v10 }
  0xeb   :  { %235 = shalt.err (!%p232_p0)
}
  0xec   :  { %152 = dma.vmem_to_hbm [thread:$0]  %s147_s25, 256, %s301_s3, [#allocation4], %s251_s15, %s251_s15, %s252_s16  }
  0xed   :  { %248 = dma.done.wait [#allocation4], 256  }
  0xee   :  { %249 = vsyncadd [#allocation4], 4294967040 }
  0xef   :  { %156 = vsyncpa [#allocation3], 1 }
  0xf0   :  { %157 = vsyncpa [#allocation6], 1 }
  0xf1   :  { %158 = vsyncpa [#allocation4], 1 }

</bundles_post_ra>
